<compile_context>
chip_gen: v7x
topology: tpu7x:2x2x1
jax: 0.10.0
libtpu: 0.0.40
codegen_flags: <defaults>
</compile_context>

<pallas_src>
import jax
import jax.numpy as jnp
from jax.experimental import pallas as pl
from jax.experimental.pallas import tpu as pltpu


# ----------------------------------------------------------------------------
# Kernel 1: fused 1x1 conv (channels-first matmul) + folded-BN bias + SiLU
# ----------------------------------------------------------------------------
def conv1x1_silu_cf_kernel(x_ref, w_ref, b_ref, o_ref):
    # x_ref: (1, Cin, TP) f32, w_ref: (Cout, Cin) bf16, b_ref: (Cout, 1) f32
    x = x_ref[0].astype(jnp.bfloat16)                       # bf16 MXU inputs
    acc = jnp.dot(w_ref[...], x, preferred_element_type=jnp.float32)
    acc = acc + b_ref[...]                                  # lane-broadcast bias
    o_ref[0] = (acc * jax.nn.sigmoid(acc)).astype(o_ref.dtype)   # SiLU in f32


def _pick_pixel_tile(hw, cap=2048):
    """Largest pixel tile that divides hw and stays bounded (keeps VMEM blocks
    small and the grid deep enough to pipeline / feed both v7x cores)."""
    if hw <= cap:
        return hw
    start = cap - cap % 128
    for t in range(start, 0, -128):
        if hw % t == 0:
            return t
    for t in range(cap, 0, -1):
        if hw % t == 0:
            return t
    return hw


def conv1x1_silu_cf(x_cf, w_cf, b_cf, *, pixel_tile=2048,
                    out_dtype=jnp.bfloat16):
    # x_cf: (N, Cin, HW) f32, w_cf: (Cout, Cin), b_cf: (Cout, 1)
    N, Cin, HW = x_cf.shape
    Cout = w_cf.shape[0]
    tp = _pick_pixel_tile(HW, pixel_tile)
    grid = (N, HW // tp)
    return pl.pallas_call(
        conv1x1_silu_cf_kernel,
        out_shape=jax.ShapeDtypeStruct((N, Cout, HW), out_dtype),
        grid=grid,
        in_specs=[
            pl.BlockSpec((1, Cin, tp), lambda n, t: (n, 0, t)),
            pl.BlockSpec((Cout, Cin), lambda n, t: (0, 0)),
            pl.BlockSpec((Cout, 1), lambda n, t: (0, 0)),
        ],
        out_specs=pl.BlockSpec((1, Cout, tp), lambda n, t: (n, 0, t)),
        compiler_params=pltpu.CompilerParams(
            dimension_semantics=("parallel", "parallel")),
    )(x_cf, w_cf.astype(jnp.bfloat16), b_cf.astype(jnp.float32))


# ----------------------------------------------------------------------------
# Kernel 2: SPPF cascade (k=5 applied 1x/2x/3x == k=5/9/13) fused with
#           concat + cv2 (1x1 conv) + folded-BN bias + SiLU
# ----------------------------------------------------------------------------
def make_sppf_cv2_kernel(W, HW, pool_k=5):
    p = pool_k // 2

    def kernel(y_ref, w_ref, b_ref, hmap_ref, wmap_ref, o_ref):
        y = y_ref[0]                         # (c_, HW) bf16
        h_map = hmap_ref[...]                # (1, HW) int32: pixel -> row
        w_map = wmap_ref[...]                # (1, HW) int32: pixel -> col

        # Shift/mask pairs for one separable 5x5 pass, built once and reused
        # by all three cascaded pools.  Masks are derived from rolled index
        # maps, so they are independent of the roll direction convention and
        # reject every wrap-around lane (replaces the -inf pad + concatenate
        # temporaries of the previous version; rolls go to the XLU slot).
        def axis_shifts(step, same_map, moved_map):
            pairs = []
            for s in range(1, p + 1):
                for sign in (1, -1):
                    amt = (sign * s * step) % HW
                    src_same = pltpu.roll(same_map, shift=amt, axis=1)
                    src_moved = pltpu.roll(moved_map, shift=amt, axis=1)
                    d = src_moved - moved_map
                    valid = (src_same == same_map) & ((d == s) | (d == -s))
                    pairs.append((amt, valid))
            return pairs

        w_shifts = axis_shifts(1, h_map, w_map)   # neighbours along columns
        h_shifts = axis_shifts(W, w_map, h_map)   # neighbours along rows

        def pool1d(t, pairs):
            acc = t
            for amt, valid in pairs:
                r = pltpu.roll(t, shift=amt, axis=1)
                acc = jnp.where(valid, jnp.maximum(acc, r), acc)
            return acc

        def pool5(t):                       # MaxPool(k=5, stride=1, pad=2)
            return pool1d(pool1d(t, w_shifts), h_shifts)

        p5 = pool5(y)                       # == MaxPool k=5
        p9 = pool5(p5)                      # == MaxPool k=9  (SPPF cascade)
        p13 = pool5(p9)                     # == MaxPool k=13

        # cv2 over the *virtual* concat [y, p5, p9, p13]: w2 is pre-split into
        # four (C2, c_) chunks, so the concat tensor never exists anywhere.
        acc = jnp.dot(w_ref[0], y, preferred_element_type=jnp.float32)
        acc = acc + jnp.dot(w_ref[1], p5, preferred_element_type=jnp.float32)
        acc = acc + jnp.dot(w_ref[2], p9, preferred_element_type=jnp.float32)
        acc = acc + jnp.dot(w_ref[3], p13, preferred_element_type=jnp.float32)
        acc = acc + b_ref[...]
        o_ref[0] = (acc * jax.nn.sigmoid(acc)).astype(o_ref.dtype)

    return kernel


def sppf_cv2_fused(y_cf, w2_cf, b2_cf, H, W):
    # y_cf: (N, c_, HW) bf16, w2_cf: (C2, 4*c_), b2_cf: (C2, 1)
    N, c_, HW = y_cf.shape
    C2 = w2_cf.shape[0]
    # split cv2 weight along Cin into the 4 concat chunks [y, p5, p9, p13]
    w2s = jnp.stack([w2_cf[:, j * c_:(j + 1) * c_] for j in range(4)],
                    axis=0).astype(jnp.bfloat16)            # (4, C2, c_)
    idx = jnp.arange(HW, dtype=jnp.int32)
    h_map = (idx // W)[None, :]                             # (1, HW)
    w_map = (idx % W)[None, :]                              # (1, HW)
    kernel = make_sppf_cv2_kernel(W, HW)
    return pl.pallas_call(
        kernel,
        out_shape=jax.ShapeDtypeStruct((N, C2, HW), jnp.float32),
        grid=(N,),
        in_specs=[
            pl.BlockSpec((1, c_, HW), lambda n: (n, 0, 0)),
            pl.BlockSpec((4, C2, c_), lambda n: (0, 0, 0)),
            pl.BlockSpec((C2, 1), lambda n: (0, 0)),
            pl.BlockSpec((1, HW), lambda n: (0, 0)),
            pl.BlockSpec((1, HW), lambda n: (0, 0)),
        ],
        out_specs=pl.BlockSpec((1, C2, HW), lambda n: (n, 0, 0)),
        compiler_params=pltpu.CompilerParams(
            dimension_semantics=("parallel",)),
    )(y_cf, w2s, b2_cf.astype(jnp.float32), h_map, w_map)


# ----------------------------------------------------------------------------
# Parameter construction (deterministic) + BN folding (channels-first)
# ----------------------------------------------------------------------------
def fuse_conv_bn(w_oihw, gamma, beta, mean, var, eps=1e-3):
    # (Cout, Cin, 1, 1) conv + eval BN -> (Cout, Cin) weight, (Cout, 1) bias
    w = w_oihw[:, :, 0, 0]                          # (Cout, Cin)
    scale = gamma / jnp.sqrt(var + eps)             # (Cout,)
    w_eff = w * scale[:, None]
    b_eff = (beta - mean * scale)[:, None]
    return w_eff.astype(jnp.float32), b_eff.astype(jnp.float32)


def init_spp_params(key, c1, c2, ks=(5, 9, 13)):
    c_ = c1 // 2
    cin2 = c_ * (len(ks) + 1)
    k1, k2, k3, k4 = jax.random.split(key, 4)
    w1 = 0.1 * jax.random.normal(k1, (c_, c1, 1, 1), jnp.float32)
    g1 = 1.0 + 0.05 * jax.random.normal(k2, (c_,), jnp.float32)
    b1 = 0.05 * jnp.arange(c_, dtype=jnp.float32)
    m1 = 0.01 * jnp.arange(c_, dtype=jnp.float32)
    v1 = 0.5 + 0.1 * jnp.arange(c_, dtype=jnp.float32)
    w2 = 0.1 * jax.random.normal(k3, (c2, cin2, 1, 1), jnp.float32)
    g2 = 1.0 + 0.05 * jax.random.normal(k4, (c2,), jnp.float32)
    b2 = -0.02 * jnp.arange(c2, dtype=jnp.float32)
    m2 = 0.01 * jnp.arange(c2, dtype=jnp.float32)
    v2 = 0.5 + 0.05 * jnp.arange(c2, dtype=jnp.float32)
    return fuse_conv_bn(w1, g1, b1, m1, v1), fuse_conv_bn(w2, g2, b2, m2, v2)


# ----------------------------------------------------------------------------
# SPP forward (NCHW in / NCHW out — channels-first end to end, no transposes)
# ----------------------------------------------------------------------------
def spp_forward(x_nchw, params, ks=(5, 9, 13)):
    assert tuple(ks) == (5, 9, 13), "fused SPPF cascade assumes k=(5,9,13)"
    (w1, b1), (w2, b2) = params
    N, C1, H, W = x_nchw.shape
    x_cf = x_nchw.reshape(N, C1, H * W)              # free reshape
    y_cf = conv1x1_silu_cf(x_cf, w1, b1)             # (N, c_, HW) bf16
    z_cf = sppf_cv2_fused(y_cf, w2, b2, H, W)        # (N, C2, HW) f32
    return z_cf.reshape(N, w2.shape[0], H, W)        # already NCHW


# ----------------------------------------------------------------------------
# Pure-JAX reference (same bf16 cast points as the kernels) for correctness
# ----------------------------------------------------------------------------
def spp_reference(x_nchw, params, ks=(5, 9, 13)):
    (w1, b1), (w2, b2) = params
    bf = jnp.bfloat16
    y = jnp.einsum('oc,nchw->nohw', w1.astype(bf), x_nchw.astype(bf),
                   preferred_element_type=jnp.float32)
    y = y + b1.reshape(1, -1, 1, 1)
    y = (y * jax.nn.sigmoid(y)).astype(bf)
    pools = [y]
    for k in ks:
        p = k // 2
        m = jax.lax.reduce_window(
            y, jnp.array(-jnp.inf, dtype=y.dtype), jax.lax.max,
            (1, 1, k, k), (1, 1, 1, 1),
            [(0, 0), (0, 0), (p, p), (p, p)])
        pools.append(m)
    cat = jnp.concatenate(pools, axis=1)
    z = jnp.einsum('oc,nchw->nohw', w2.astype(bf), cat,
                   preferred_element_type=jnp.float32)
    z = z + b2.reshape(1, -1, 1, 1)
    return z * jax.nn.sigmoid(z)


if __name__ == "__main__":
    key = jax.random.PRNGKey(0)
    kx, kp = jax.random.split(key)

    N, C1, H, W = 2, 8, 16, 16    # c1=8 -> c_=4, concat channels = 16
    C2 = 16

    x = jax.random.normal(kx, (N, C1, H, W), jnp.float32)
    params = init_spp_params(kp, C1, C2)

    out = jax.block_until_ready(spp_forward(x, params))
    ref = jax.block_until_ready(spp_reference(x, params))

    assert out.shape == (N, C2, H, W), out.shape
    err = float(jnp.max(jnp.abs(out - ref)))
    assert err < 1e-2, err
    print("KERNEL_OK")
</pallas_src>

<mosaic_0001>
module attributes {stable_mosaic.version = 11 : i64} {
  func.func @conv1x1_silu_cf_kernel(%arg0: i32, %arg1: i32, %arg2: memref<1x8x256xf32, #tpu.memory_space<vmem>>, %arg3: memref<4x8xbf16, #tpu.memory_space<vmem>>, %arg4: memref<4x1xf32, #tpu.memory_space<vmem>>, %arg5: memref<1x4x256xbf16, #tpu.memory_space<vmem>>) attributes {dimension_semantics = [#tpu.dimension_semantics<parallel>, #tpu.dimension_semantics<parallel>], iteration_bounds = array<i64: 2, 1>, scalar_prefetch = 0 : i64, scratch_operands = 0 : i64, tpu.core_type = #tpu.core_type<tc>, window_params = [{transform_indices = @transform_0, window_bounds = array<i64: 1, 8, 256>}, {pipeline_mode = #tpu.pipeline_mode<synchronous>, transform_indices = @transform_1, window_bounds = array<i64: 4, 8>}, {pipeline_mode = #tpu.pipeline_mode<synchronous>, transform_indices = @transform_2, window_bounds = array<i64: 4, 1>}, {transform_indices = @transform_3, window_bounds = array<i64: 1, 4, 256>}]} {
    %c0 = arith.constant 0 : index
    %c0_0 = arith.constant 0 : index
    %c0_1 = arith.constant 0 : index
    %0 = vector.load %arg2[%c0, %c0_0, %c0_1] : memref<1x8x256xf32, #tpu.memory_space<vmem>>, vector<1x8x256xf32>
    %1 = vector.shape_cast %0 : vector<1x8x256xf32> to vector<8x256xf32>
    %2 = arith.truncf %1 : vector<8x256xf32> to vector<8x256xbf16>
    %c0_2 = arith.constant 0 : index
    %c0_3 = arith.constant 0 : index
    %3 = vector.load %arg3[%c0_2, %c0_3] : memref<4x8xbf16, #tpu.memory_space<vmem>>, vector<4x8xbf16>
    %cst = arith.constant dense<0.000000e+00> : vector<4x256xf32>
    %4 = tpu.matmul %3, %2, %cst {dimension_numbers = #tpu.dot_dimension_numbers<[1], [0], [0], [1], [0, 0, 1, 1], [], []>} : vector<4x8xbf16>, vector<8x256xbf16>, vector<4x256xf32> -> vector<4x256xf32>
    %c0_4 = arith.constant 0 : index
    %c0_5 = arith.constant 0 : index
    %5 = vector.load %arg4[%c0_4, %c0_5] : memref<4x1xf32, #tpu.memory_space<vmem>>, vector<4x1xf32>
    %6 = vector.broadcast %5 : vector<4x1xf32> to vector<4x256xf32>
    %7 = arith.addf %4, %6 : vector<4x256xf32>
    %8 = arith.negf %7 : vector<4x256xf32>
    %9 = math.exp %8 : vector<4x256xf32>
    %cst_6 = arith.constant 1.000000e+00 : f32
    %10 = vector.broadcast %cst_6 : f32 to vector<4x256xf32>
    %11 = arith.addf %10, %9 : vector<4x256xf32>
    %12 = arith.divf %10, %11 : vector<4x256xf32>
    %13 = arith.mulf %7, %12 : vector<4x256xf32>
    %14 = arith.truncf %13 : vector<4x256xf32> to vector<4x256xbf16>
    %c0_7 = arith.constant 0 : index
    %c0_8 = arith.constant 0 : index
    %c0_9 = arith.constant 0 : index
    %15 = vector.load %arg5[%c0_7, %c0_8, %c0_9] : memref<1x4x256xbf16, #tpu.memory_space<vmem>>, vector<1x4x256xbf16>
    %16 = vector.shape_cast %15 : vector<1x4x256xbf16> to vector<4x256xbf16>
    %17 = vector.shape_cast %14 : vector<4x256xbf16> to vector<1x4x256xbf16>
    tpu.vector_store %arg5[%c0_7, %c0_8, %c0_9], %17 {strides = array<i32>} : memref<1x4x256xbf16, #tpu.memory_space<vmem>>, vector<1x4x256xbf16>,
    return
  }
  func.func @transform_0(%arg0: i32, %arg1: i32) -> (i32, i32, i32) {
    %c0_i32 = arith.constant 0 : i32
    %c0_i32_0 = arith.constant 0 : i32
    return %arg0, %c0_i32, %arg1 : i32, i32, i32
  }
  func.func @transform_1(%arg0: i32, %arg1: i32) -> (i32, i32) {
    %c0_i32 = arith.constant 0 : i32
    %c0_i32_0 = arith.constant 0 : i32
    %c0_i32_1 = arith.constant 0 : i32
    return %c0_i32, %c0_i32_0 : i32, i32
  }
  func.func @transform_2(%arg0: i32, %arg1: i32) -> (i32, i32) {
    %c0_i32 = arith.constant 0 : i32
    %c0_i32_0 = arith.constant 0 : i32
    %c0_i32_1 = arith.constant 0 : i32
    return %c0_i32, %c0_i32_0 : i32, i32
  }
  func.func @transform_3(%arg0: i32, %arg1: i32) -> (i32, i32, i32) {
    %c0_i32 = arith.constant 0 : i32
    %c0_i32_0 = arith.constant 0 : i32
    return %arg0, %c0_i32, %arg1 : i32, i32, i32
  }
}

</mosaic_0001>

<bundles_post_ra>
// kernel: tpu_custom_call.1
= control target key start
LH: loop header
LB: loop body
LE: loop exit
PB: predicated region body
PF: predicated region fallthrough
CT: control target
= control target key end

     0   :  { %8 = vsyncpa [#allocation3], 0  ;;  %s811_s0 = inlined_call_operand.hbm [shape: f32[2,8,256], index: 0, kind: input, shape index: {}]   ;;  %s812_s1 = inlined_call_operand.vmem [shape: bf16[4,8], index: 1, kind: input, shape index: {}]   ;;  %s813_s2 = inlined_call_operand.vmem [shape: f32[4,1], index: 2, kind: input, shape index: {}]   ;;  %s814_s3 = inlined_call_operand.hbm [shape: bf16[2,4,256], index: 3, kind: output, shape index: {}]  }
   0x1   :  { %10 = vsyncpa [#allocation3 + $0x1], 0 }
   0x2   :  { %11 = vsyncpa [#allocation4], 0 }
   0x3   :  { %13 = vsyncpa [#allocation4 + $0x1], 0  ;;  %s632_s12 = smov 0   ;;  %s634_s13 = smov 0  }
   0x4   :  { %s636_s14 = smov 0   ;;  %s638_s15 = smov 0  }
   0x5   :  { %s640_s16 = smov 0   ;;  %s642_s17 = smov 0  }
   0x6 LB: > { %s400_s18 = sadd.s32 4294967295, %s607_s17   ;;  %s401_s19 = sadd.s32 4294967294, %s607_s17   ;;  %s607_s17 = sphi %s642_s17, %s19_s17   ;;  %s603_s16 = sphi %s640_s16, %s830_s16   ;;  %s599_s15 = sphi %s638_s15, %s829_s15   ;;  %s595_s14 = sphi %s636_s14, %s828_s14   ;;  %s591_s13 = sphi %s634_s13, %s827_s13   ;;  %s587_s12 = sphi %s632_s12, %s826_s12  }
   0x7   : > { %s31_s20 = sadd.s32 1, %s603_s16  ;;  %s40_s21 = sadd.s32 1, %s595_s14 }
   0x8   : > { %p33_p0 = scmp.ge.s32.totalorder %s31_s20, 2  ;;  %p47_p1 = scmp.ne.s32.totalorder %s595_s14, %s591_s13 }
   0x9   : > { %p48_p2 = scmp.eq.s32.totalorder %s607_s17, 0  ;;  %p53_p3 = scmp.ne.s32.totalorder %s591_s13, %s587_s12 }
   0xa   : > { %s832_s20 = smov (%p33_p0, %s31_s20), 0  ;;  %p54_p5 = scmp.eq.s32.totalorder %s400_s18, 0 }
   0xb   : > { %p673_p4 = por %p48_p2, %p47_p1  ;;  %s35_s23 = ssub.s32 %s603_s16, %s832_s20 }
   0xc   : > { %p121_p6 = scmp.eq.s32.totalorder %s400_s18, 1  ;;  %p38_p7 = scmp.eq.s32.totalorder %s35_s23, 0 }
   0xd   : > { %p679_p8 = por %p54_p5, %p53_p3  ;;  %p127_p10 = scmp.eq.s32.totalorder %s401_s19, 1 }
   0xe   : > { %p683_p9 = por %p121_p6, %p47_p1  ;;  %p435_p13 = scmp.lt.s32.totalorder %s607_s17, 2 }
   0xf   : > { %s688_s26 = scalar_select %p38_p7, %s595_s14, %s40_s21  }
  0x10   : > { %s818_s25 = scalar_select %p683_p9, 1, 0 }
  0x11   : > { %p690_p11 = por %p127_p10, %p53_p3  ;;  %s153_s28 = sand.u32 1, %s595_s14  }
  0x12   : > { %s404_s29 = sshll.u32 %s153_s28, 4  ;;  %s421_s30 = sshll.u32 %s603_s16, 8 }
  0x13   : > { %s819_s27 = scalar_select %p690_p11, 1, 0 }
  0x14   : > { %s701_s6 = scalar_lea.hbm %s811_s0, %s421_s30  ;;  %s157_s7 = scalar_lea.vmem [#allocation2], %s404_s29 }
  0x15   : > { %s167_s8 = sshll.u32 %s157_s7, 4  ;;  %p707_p0 = pnand %p435_p13, %p673_p4  ;;  %s703_s8 = int_to_ptr.vmem [resolvable:$true] %s167_s8 }
  0x16   : > { %s154_s10 = scalar_lea.sflag [#allocation3], %s153_s28  ;;  %s495_s11 = scalar_lea.hbm %s701_s6, 256 }
  0x17   : > { %p496_p3 = scmp.ne.s32.totalorder %s701_s6, %s495_s11  ;;  %p497_p5 = pneg %p707_p0 }
  0x18   : > { %s500_s21 = scalar_lea.hbm %s811_s0, 512  ;;  %p501_p4 = scmp.lt.u32.totalorder %s701_s6, %s811_s0 }
  0x19   : > { %p498_p6 = pnand %p497_p5, %p496_p3  ;;  %p502_p10 = scmp.lt.u32.totalorder %s500_s21, %s495_s11 }
  0x1a   : > { %p504_p12 = scmp.lt.u32.totalorder %s495_s11, %s701_s6 }
  0x1b   : > { %p499_p7 = pneg %p498_p6  ;;  %p503_p13 = por %p502_p10, %p501_p4 }
  0x1d   : > { %p505_p1 = por %p504_p12, %p503_p13 }
  0x1f   : > { %p506_p2 = pnand %p505_p1, %p499_p7 }
  0x21   : > { %509 = shalt.err (!%p506_p2)
}
  0x22   : > { %s510_s28 = scalar_lea.vmem %s703_s8, 256  ;;  %s609_s29 = smov [#allocation2]  }
  0x23   : > { %p511_p3 = scmp.ne.s32.totalorder %s703_s8, %s510_s28  ;;  %s515_s30 = sshll.u32 %s609_s29, 4  ;;  %s516_s30 = int_to_ptr.vmem [resolvable:$false] %s515_s30 }
  0x24   : > { %s517_s4 = scalar_lea.vmem %s516_s30, 512  ;;  %p518_p9 = scmp.lt.s32.totalorder %s703_s8, %s516_s30 }
  0x25   : > { %p513_p6 = pnand %p511_p3, %p497_p5  ;;  %p519_p4 = scmp.lt.s32.totalorder %s517_s4, %s510_s28 }
  0x27   : > { %p514_p11 = pneg %p513_p6  ;;  %p520_p10 = por %p519_p4, %p518_p9 }
  0x29   : > { %p521_p12 = pnand %p520_p10, %p514_p11 }
  0x2b   : > { %524 = shalt.err (!%p521_p12)
}
  0x2c   : > { %430 = dma.hbm_to_vmem [thread:$0]  (!%p707_p0), %s701_s6, 256, %s703_s8, %s154_s10  }
  0x2d   : > { %p821_p1 = scmp.lt.s32.totalorder %s607_s17, 3  ;;  %p822_p2 = scmp.ge.s32.totalorder %s607_s17, 1 }
  0x2f   : > { %p173_p5 = pnand %p822_p2, %p821_p1 }
  0x30   : > { %s743_s5 = sand.u32 (!%p173_p5), 1, %s591_s13  }
  0x31   : > { %176 = sbr.rel (%p173_p5) target bundleno = 323 (0x143), region = 32  ;;  %s408_s7 = sshll.u32 (!%p173_p5), %s743_s5, 4 }
  0x32   : > { %s179_s11 = scalar_lea.sflag (!%p173_p5), [#allocation3], %s743_s5  ;;  %s182_s18 = scalar_lea.vmem (!%p173_p5), [#allocation2], %s408_s7 }
  0x38   : > { %578 = dma.done.wait (%p679_p8), %s179_s11, 256  }
  0x39   : > { %580 = vsyncadd (%p679_p8), %s179_s11, 4294967040  ;;  %v610_v0 = vmov 0   ;;  %v209_v1 = vld [vmem:[%s182_s18 + $0x8] sm:$0xff]  ;;  %vm223_vm0 = vcmask 1043456   ;;  %v208_v2 = vld [vmem:[%s182_s18] sm:$0xff]  ;;  %vm219_vm1 = vcmask 64512  }
  0x3a   : > { %262 = vmatprep.mubr.bf16.mxu0 %v610_v0  ;;  %486 = vset.pattern.permute.xlu0 %v610_v0  ;;  %v211_v3 = vpack.c.bf16 %v209_v1, %v209_v1  ;;  %v210_v4 = vpack.c.bf16 %v208_v2, %v208_v2  ;;  %v213_v5 = vld [vmem:[%s813_s2] sm:$0xf]  ;;  %s409_s24 = sshll.u32 %s743_s5, 2  ;;  %s422_s19 = sshll.u32 %s599_s15, 6 }
  0x3b   : > { %216 = vperm.xlu0 %486, %v213_v5   ;;  %v212_v7 = vld [vmem:[%s812_s1] sm:$0x3]  ;;  %s204_s21 = scalar_lea.vmem [#allocation5], %s409_s24  ;;  %s762_s29 = scalar_lea.hbm %s814_s3, %s422_s19 }
  0x3c   : > { %410 = vmatprep.subr.msk.bf16.mxu0 %vm223_vm0, %v211_v3  ;;  %v225_v6 = vsel %vm223_vm0, %v210_v4, 0  ;;  %s316_s22 = sshll.u32 %s204_s21, 4  ;;  %s300_s30 = scalar_lea.sflag [#allocation4], %s743_s5  ;;  %s764_s22 = int_to_ptr.vmem [resolvable:$true] %s316_s22 }
  0x3d   : > { %231 = vmatpush1.bf16.msra.mxu0 %v225_v6  ;;  %s525_s4 = scalar_lea.vmem %s764_s22, 64  ;;  %p823_p9 = scmp.ne.s32.totalorder %s818_s25, 0 }
  0x3e   : > { %p526_p8 = scmp.ne.s32.totalorder %s764_s22, %s525_s4  ;;  %s611_s15 = smov [#allocation5]  }
  0x3f   : > { %s529_s7 = sshll.u32 %s611_s15, 4  ;;  %s530_s7 = int_to_ptr.vmem [resolvable:$false] %s529_s7 }
  0x40   : > { %411 = vmatmul.mubr.msk.bf16.vlgmr.msra.gmra.mrb[0].mxu0 %vm219_vm1, %v212_v7  ;;  %p527_p11 = pnand %p526_p8, %p823_p9  ;;  %s531_s11 = scalar_lea.vmem %s530_s7, 128 }
  0x41   : > { %p532_p7 = scmp.lt.s32.totalorder %s764_s22, %s530_s7  ;;  %p533_p13 = scmp.lt.s32.totalorder %s531_s11, %s525_s4 }
  0x42   : > { %p528_p0 = pneg %p527_p11 }
  0x43   : > { %p534_p3 = por %p533_p13, %p532_p7 }
  0x45   : > { %p535_p6 = pnand %p534_p3, %p528_p0 }
  0xba   : > { %v217_v8 = vpop.permute.xlu0 %216 }
 0x113   : > { %v264_v9 = vpop.f32.mrb[0].mxu0 }
 0x114   : > { %v265_v10 = vadd.f32 %v264_v9, %v217_v8  ;;  %v266_v11 = vpop.f32.mrb[1].mxu0 }
 0x115   : > { %v267_v12 = vadd.f32 %v266_v11, %v217_v8  ;;  %v268_v13 = vpop.f32.mrb[2].mxu0 }
 0x116   : > { %v412_v14 = vmul.f32 -1.442695, %v265_v10  ;;  %v269_v15 = vpop.f32.mrb[3].mxu0 }
 0x117   : > { %v413_v16 = vmul.f32 -1.442695, %v267_v12 }
 0x118   : > { %487 = vpow2.f32 %v412_v14 }
 0x119   : > { %489 = vpow2.f32 %v413_v16 }
 0x122   : > { %v488_v17 = vpop.eup %487 }
 0x123   : > { %v490_v18 = vpop.eup %489  ;;  %v277_v19 = vadd.f32 1.0, %v488_v17 }
 0x124   : > { %v278_v20 = vadd.f32 1.0, %v490_v18 }
 0x125   : > { %491 = vrcp.f32 %v277_v19 }
 0x126   : > { %493 = vrcp.f32 %v278_v20 }
 0x12f   : > { %v492_v21 = vpop.eup %491 }
 0x130   : > { %v494_v22 = vpop.eup %493  ;;  %v283_v23 = vmul.f32 %v492_v21, %v265_v10 }
 0x131   : > { %v284_v24 = vmul.f32 %v494_v22, %v267_v12 }
 0x133   : > { %v414_v25 = vpack.c.bf16 %v284_v24, %v283_v23 }
 0x135   : > { %415 = vst.sshfl [vmem:[%s204_s21] sm:$0x33 pattern:$0x76325410] %v414_v25 }
 0x136   : > { %538 = shalt.err (!%p535_p6)
}
 0x137   : > { %s539_s5 = scalar_lea.hbm %s762_s29, 64  ;;  %s543_s8 = scalar_lea.hbm %s814_s3, 128 }
 0x138   : > { %p540_p4 = scmp.ne.s32.totalorder %s762_s29, %s539_s5  ;;  %p544_p1 = scmp.lt.u32.totalorder %s762_s29, %s814_s3 }
 0x139   : > { %p545_p2 = scmp.lt.u32.totalorder %s543_s8, %s539_s5  ;;  %p547_p8 = scmp.lt.u32.totalorder %s539_s5, %s762_s29 }
 0x13a   : > { %p541_p10 = pnand %p540_p4, %p823_p9 }
 0x13b   : > { %p546_p5 = por %p545_p2, %p544_p1 }
 0x13c   : > { %p542_p12 = pneg %p541_p10 }
 0x13d   : > { %p548_p11 = por %p547_p8, %p546_p5 }
 0x13f   : > { %p549_p0 = pnand %p548_p11, %p542_p12 }
 0x141   : > { %552 = shalt.err (!%p549_p0)
}
 0x142   : > { %425 = dma.vmem_to_hbm [thread:$0]  (%p823_p9), %s764_s22, 64, %s762_s29, %s300_s30  }
 0x143 PF: > { %s328_s24 = sand.u32 1, %s587_s12   ;;  %p824_p7 = scmp.ne.s32.totalorder %s819_s27, 0 }
 0x144   : > { %p825_p13 = scmp.ge.s32.totalorder %s607_s17, 2  ;;  %s329_s19 = scalar_lea.sflag [#allocation4], %s328_s24 }
 0x146   : > { %p432_p3 = pnand %p825_p13, %p824_p7 }
 0x148   : > { %582 = dma.done.wait (!%p432_p3), %s329_s19, 64  }
 0x149   : > { %584 = vsyncadd (!%p432_p3), %s329_s19, 4294967232  ;;  %s19_s17 = sadd.s32 1, %s607_s17   ;;  %s826_s12 = smov %s591_s13 }
 0x14a   : > { %p16_p6 = scmp.ge.s32.totalorder %s19_s17, 4   ;;  %s827_s13 = smov %s595_s14 }
 0x14b   : > { %s828_s14 = smov %s688_s26  ;;  %s829_s15 = smov %s603_s16 }
 0x14c   : > { %s830_s16 = smov %s832_s20  ;;  %18 = sbr.rel (!%p16_p6) target bundleno = 6 (0x6), region = 77 }
 0x153   :  { %334 = vsyncpa [#allocation3], 1 }
 0x154   :  { %336 = vsyncpa [#allocation3 + $0x1], 1 }
 0x155   :  { %337 = vsyncpa [#allocation4], 1 }
 0x156   :  { %339 = vsyncpa [#allocation4 + $0x1], 1 }

</bundles_post_ra>
